<compile_context>
chip_gen: v5e
topology: v5e:2x2
jax: 0.10.0
libtpu: 0.0.40
codegen_flags: <defaults>
</compile_context>

<pallas_src>
import jax
import jax.numpy as jnp
from jax.experimental import pallas as pl
from jax.experimental.pallas import tpu as pltpu


_TARGET_BLOCK_BYTES = 4 << 20        # ~4 MiB f32 per (tr, tl) block
_MIN_SPLIT_BLOCK_BYTES = 512 << 10   # don't shrink blocks below ~512 KiB when
                                     # splitting for multi-core parallelism


# ----------------------------------------------------------------------------
# Pallas kernel: streamed modulation  out = gamma * x + beta
# ----------------------------------------------------------------------------
def _modulate_kernel(gamma_ref, beta_ref, x_ref, out_ref):
    # gamma/beta blocks are (tr, 1): per-lane VPU FMA with a row broadcast.
    # HBM-bound kernel -> the broadcast work is hidden under the DMA time.
    out_ref[...] = gamma_ref[...] * x_ref[...] + beta_ref[...]


def _largest_aligned_divisor(n, align, cap):
    """Largest divisor of n that is a multiple of `align` and <= cap (or None)."""
    cap = min(n, cap)
    best = None
    for t in range(align, cap + 1, align):
        if n % t == 0:
            best = t
    return best


def _select_tiles(R, L, itemsize):
    """Pick (tr, tl) for the (R, L) modulation, or None to fall back to XLA."""
    target_elems = _TARGET_BLOCK_BYTES // itemsize

    # Lane tile: largest divisor of L that is a multiple of 128 (lane-dense
    # output stores), capped so even an 8-row block stays within the budget.
    tl = _largest_aligned_divisor(L, 128, max(128, target_elems // 8))
    if tl is None:
        return None  # L < 128 or no lane-aligned tiling: let XLA fuse it.

    # Row tile: largest divisor of R that is a multiple of 8, sized so that
    # tr * tl ~ byte budget (rows rise well above 256 when L is short).
    tr = _largest_aligned_divisor(R, 8, max(8, target_elems // tl))
    if tr is None:
        # R not a multiple of 8: the full extent is legal (sublane-padded);
        # only take it if it doesn't blow the budget badly.
        if R * tl * itemsize <= 8 * _TARGET_BLOCK_BYTES:
            tr = R
        else:
            return None

    # Guarantee >= 2 grid steps (ideally >= 4) so both v7x TensorCores get
    # work, without shrinking blocks below ~512 KiB.
    for _ in range(3):
        steps = (R // tr) * (L // tl)
        if steps >= 4:
            break
        if tl > 128 and tr * (tl // 2) * itemsize >= _MIN_SPLIT_BLOCK_BYTES:
            half = _largest_aligned_divisor(L, 128, tl // 2)
            if half is not None:
                tl = half
                continue
        if tr > 8 and (tr // 2) * tl * itemsize >= _MIN_SPLIT_BLOCK_BYTES:
            half = _largest_aligned_divisor(R, 8, tr // 2)
            if half is not None:
                tr = half
                continue
        break
    return tr, tl


def _modulate_pallas(gamma_flat, beta_flat, x_flat, tr, tl):
    R, L = x_flat.shape
    itemsize = jnp.dtype(x_flat.dtype).itemsize
    block_bytes = tr * tl * itemsize
    # Double-buffered x-in + out blocks dominate the footprint; gamma/beta
    # (tr, 1) blocks are negligible.  2x headroom, capped under v7x's 64 MiB.
    footprint = 4 * block_bytes + 4 * tr * itemsize
    vmem_limit = int(min(64 << 20, max(2 * footprint, 16 << 20)))
    grid = (R // tr, L // tl)
    return pl.pallas_call(
        _modulate_kernel,
        out_shape=jax.ShapeDtypeStruct((R, L), x_flat.dtype),
        grid=grid,
        in_specs=[
            # gamma/beta depend only on the row axis -> stay VMEM-resident
            # across all L-tiles of a row block (no redundant DMA).
            pl.BlockSpec((tr, 1), lambda r, l: (r, 0)),
            pl.BlockSpec((tr, 1), lambda r, l: (r, 0)),
            pl.BlockSpec((tr, tl), lambda r, l: (r, l)),
        ],
        out_specs=pl.BlockSpec((tr, tl), lambda r, l: (r, l)),
        compiler_params=pltpu.CompilerParams(
            dimension_semantics=("parallel", "parallel"),
            vmem_limit_bytes=vmem_limit),
        cost_estimate=pl.CostEstimate(
            flops=2 * R * L,
            transcendentals=0,
            bytes_accessed=(2 * R * L + 2 * R) * itemsize),
    )(gamma_flat, beta_flat, x_flat)


# ----------------------------------------------------------------------------
# Forward
# ----------------------------------------------------------------------------
def film_forward(x, conditioning, w1, b1, w2_g, b2_g, w2_b, b2_b):
    """FiLM forward.

    x:            (B, C, L) float32
    conditioning: (B, D)    float32
    w1: (D, 3C), b1: (1, 3C)          (pre-transposed nn.Linear weights)
    w2_g/w2_b: (3C, C), b2_g/b2_b: (1, C)   (fc2 pre-split into gamma/beta)
    returns (B, C, L) float32
    """
    B, C, L = x.shape

    # Stage 1: tiny conditioning MLP — left to XLA per perf review (two small
    # matmuls; a pallas_call launch here would cost more than it saves).
    # leaky_relu uses PyTorch's default negative_slope = 0.01.
    h = jnp.dot(conditioning, w1, preferred_element_type=jnp.float32) + b1
    h = jnp.where(h > 0, h, 0.01 * h)
    gamma = jnp.dot(h, w2_g, preferred_element_type=jnp.float32) + b2_g
    beta = jnp.dot(h, w2_b, preferred_element_type=jnp.float32) + b2_b

    # Stage 2: streamed, lane-dense modulation over x flattened to (B*C, L).
    R = B * C
    tiles = _select_tiles(R, L, jnp.dtype(x.dtype).itemsize)
    if tiles is None:
        # Tiny / lane-misaligned L: a Pallas block here would have lane width
        # < 128 (masked vst.msk partial stores) — let XLA fuse the FMA instead.
        return (gamma[:, :, None].astype(x.dtype) * x
                + beta[:, :, None].astype(x.dtype))

    tr, tl = tiles
    x_flat = x.reshape(R, L)
    gamma_flat = gamma.reshape(R, 1).astype(x.dtype)
    beta_flat = beta.reshape(R, 1).astype(x.dtype)
    out_flat = _modulate_pallas(gamma_flat, beta_flat, x_flat, tr, tl)
    return out_flat.reshape(B, C, L)


# ----------------------------------------------------------------------------
# Params + pure-JAX reference
# ----------------------------------------------------------------------------
def init_params(key, num_features, conditioning_dim):
    """Deterministic init matching the PyTorch module's shapes.

    nn.Linear stores weight as (out, in); we store the transpose (in, out) and
    pre-split fc2 into gamma/beta halves once, so film_forward never slices.
    """
    hidden_dim = num_features * 3
    k1, k2, k3, k4 = jax.random.split(key, 4)
    lim1 = 1.0 / jnp.sqrt(jnp.float32(conditioning_dim))
    lim2 = 1.0 / jnp.sqrt(jnp.float32(hidden_dim))
    w1 = jax.random.uniform(k1, (conditioning_dim, hidden_dim),
                            jnp.float32, -lim1, lim1)
    b1 = jax.random.uniform(k2, (1, hidden_dim), jnp.float32, -lim1, lim1)
    w2 = jax.random.uniform(k3, (hidden_dim, num_features * 2),
                            jnp.float32, -lim2, lim2)
    b2 = jax.random.uniform(k4, (1, num_features * 2), jnp.float32, -lim2, lim2)
    C = num_features
    return w1, b1, w2[:, :C], b2[:, :C], w2[:, C:], b2[:, C:]


def film_reference(x, conditioning, w1, b1, w2_g, b2_g, w2_b, b2_b):
    h = conditioning @ w1 + b1
    h = jnp.where(h > 0, h, 0.01 * h)
    gamma = h @ w2_g + b2_g
    beta = h @ w2_b + b2_b
    return gamma[:, :, None] * x + beta[:, :, None]


def _check(B, C, L, D, seed):
    key = jax.random.PRNGKey(seed)
    kx, kc, kp = jax.random.split(key, 3)
    x = jax.random.normal(kx, (B, C, L), jnp.float32)
    conditioning = jax.random.normal(kc, (B, D), jnp.float32)
    params = init_params(kp, C, D)

    out = jax.block_until_ready(film_forward(x, conditioning, *params))
    ref = film_reference(x, conditioning, *params)
    assert out.shape == (B, C, L)
    assert jnp.allclose(out, ref, atol=1e-5, rtol=1e-5), "mismatch vs reference"


if __name__ == "__main__":
    # Small lane-dense shape: exercises the Pallas modulation kernel.
    _check(B=2, C=4, L=256, D=8, seed=0)
    # Tiny L (< 128): explicit XLA-fused fallback path (no sub-128-lane blocks).
    _check(B=2, C=4, L=16, D=8, seed=1)
    # Larger shape: exercises divisor-aware L tiling (L = 2560) and the
    # multi-step grid / VMEM-limit path.
    _check(B=4, C=16, L=2560, D=12, seed=2)
    print("KERNEL_OK")
</pallas_src>

<mosaic_0001>
module attributes {stable_mosaic.version = 11 : i64} {
  func.func @_modulate_kernel(%arg0: i32, %arg1: i32, %arg2: memref<8x1xf32, #tpu.memory_space<vmem>>, %arg3: memref<8x1xf32, #tpu.memory_space<vmem>>, %arg4: memref<8x256xf32, #tpu.memory_space<vmem>>, %arg5: memref<8x256xf32, #tpu.memory_space<vmem>>) attributes {dimension_semantics = [#tpu.dimension_semantics<parallel>, #tpu.dimension_semantics<parallel>], iteration_bounds = array<i64: 1, 1>, scalar_prefetch = 0 : i64, scratch_operands = 0 : i64, tpu.core_type = #tpu.core_type<tc>, window_params = [{transform_indices = @transform_0, window_bounds = array<i64: 8, 1>}, {transform_indices = @transform_1, window_bounds = array<i64: 8, 1>}, {transform_indices = @transform_2, window_bounds = array<i64: 8, 256>}, {transform_indices = @transform_3, window_bounds = array<i64: 8, 256>}]} {
    %c0 = arith.constant 0 : index
    %c0_0 = arith.constant 0 : index
    %0 = vector.load %arg2[%c0, %c0_0] : memref<8x1xf32, #tpu.memory_space<vmem>>, vector<8x1xf32>
    %c0_1 = arith.constant 0 : index
    %c0_2 = arith.constant 0 : index
    %1 = vector.load %arg4[%c0_1, %c0_2] : memref<8x256xf32, #tpu.memory_space<vmem>>, vector<8x256xf32>
    %2 = vector.broadcast %0 : vector<8x1xf32> to vector<8x256xf32>
    %3 = arith.mulf %2, %1 : vector<8x256xf32>
    %c0_3 = arith.constant 0 : index
    %c0_4 = arith.constant 0 : index
    %4 = vector.load %arg3[%c0_3, %c0_4] : memref<8x1xf32, #tpu.memory_space<vmem>>, vector<8x1xf32>
    %5 = vector.broadcast %4 : vector<8x1xf32> to vector<8x256xf32>
    %6 = arith.addf %3, %5 : vector<8x256xf32>
    %c0_5 = arith.constant 0 : index
    %c0_6 = arith.constant 0 : index
    %7 = vector.load %arg5[%c0_5, %c0_6] : memref<8x256xf32, #tpu.memory_space<vmem>>, vector<8x256xf32>
    tpu.vector_store %arg5[%c0_5, %c0_6], %6 {strides = array<i32>} : memref<8x256xf32, #tpu.memory_space<vmem>>, vector<8x256xf32>,
    return
  }
  func.func @transform_0(%arg0: i32, %arg1: i32) -> (i32, i32) {
    %c0_i32 = arith.constant 0 : i32
    %c0_i32_0 = arith.constant 0 : i32
    return %arg0, %c0_i32 : i32, i32
  }
  func.func @transform_1(%arg0: i32, %arg1: i32) -> (i32, i32) {
    %c0_i32 = arith.constant 0 : i32
    %c0_i32_0 = arith.constant 0 : i32
    return %arg0, %c0_i32 : i32, i32
  }
  func.func @transform_2(%arg0: i32, %arg1: i32) -> (i32, i32) {
    %c0_i32 = arith.constant 0 : i32
    return %arg0, %arg1 : i32, i32
  }
  func.func @transform_3(%arg0: i32, %arg1: i32) -> (i32, i32) {
    %c0_i32 = arith.constant 0 : i32
    return %arg0, %arg1 : i32, i32
  }
}

</mosaic_0001>

<bundles_post_ra>
// kernel: tpu_custom_call.1
= control target key start
LH: loop header
LB: loop body
LE: loop exit
PB: predicated region body
PF: predicated region fallthrough
CT: control target
= control target key end

     0   :  { %v80_v1 = vmov 0   ;;  %s117_s0 = inlined_call_operand.vmem [shape: f32[8,1], index: 0, kind: input, shape index: {}]   ;;  %s118_s1 = inlined_call_operand.vmem [shape: f32[8,1], index: 1, kind: input, shape index: {}]   ;;  %s119_s2 = inlined_call_operand.vmem [shape: f32[8,256], index: 2, kind: input, shape index: {}]   ;;  %s120_s3 = inlined_call_operand.hbm [shape: f32[8,256], index: 3, kind: output, shape index: {}]  }
   0x1   :  { %v15_v0 = vld [vmem:[%s117_s0] sm:$0xff]  ;;  %53 = vset.pattern.permute.xlu0 %v80_v1 }
   0x2   :  { %8 = vsyncpa [#allocation3], 0  ;;  %20 = vperm.xlu0 %53, %v15_v0   ;;  %v25_v2 = vld [vmem:[%s118_s1] sm:$0xff]  ;;  %v17_v5 = vld [vmem:[%s119_s2 + $0x8] sm:$0xff]  ;;  %s81_s0 = smov [#allocation2]   ;;  %s42_s23 = sshll.u32 %s120_s3, 4  ;;  %s43_s23 = int_to_ptr.hbm [resolvable:$true] %s42_s23 }
   0x3   :  { %v16_v4 = vld [vmem:[%s119_s2] sm:$0xff]  ;;  %s40_s20 = sshll.u32 %s81_s0, 4  ;;  %s41_s20 = int_to_ptr.vmem [resolvable:$true] %s40_s20 }
   0xa   :  { %28 = vperm.xlu0 %53, %v25_v2  }
  0x74   :  { %v21_v3 = vpop.permute.xlu0 %20 }
  0x75   :  { %v23_v6 = vmul.f32 %v21_v3, %v16_v4  ;;  %v24_v7 = vmul.f32 %v21_v3, %v17_v5 }
  0x7c   :  { %v29_v8 = vpop.permute.xlu0 %28 }
  0x7d   :  { %v31_v9 = vadd.f32 %v29_v8, %v23_v6  ;;  %v32_v10 = vadd.f32 %v29_v8, %v24_v7 }
  0x7f   :  { %33 = vst [vmem:[#allocation2] sm:$0xff] %v31_v9 }
  0x80   :  { %34 = vst [vmem:[#allocation2 + $0x8] sm:$0xff] %v32_v10 }
  0x81   :  { %45 = dma.vmem_to_hbm [thread:$0]  %s41_s20, 256, %s43_s23, [#allocation3]  }
  0x82   :  { %78 = dma.done.wait [#allocation3], 256  }
  0x83   :  { %79 = vsyncadd [#allocation3], 4294967040 }
  0x84   :  { %50 = vsyncpa [#allocation3], 1 }

</bundles_post_ra>
